<compile_context>
chip_gen: v6e
topology: v6e:2x2x1
jax: 0.10.0
libtpu: 0.0.40
codegen_flags: <defaults>
</compile_context>

<pallas_src>
import jax
import jax.numpy as jnp
from jax.experimental import pallas as pl
from jax.experimental.pallas import tpu as pltpu


def _round_up(x, m):
    return ((x + m - 1) // m) * m


def film_kernel(ctrl_ref, din_ref,
                w1_ref, b1_ref,          # fused gamma|beta layer 1
                w2_ref, b2_ref,          # fused (block-diag, lane-padded) layer 2
                w1d_ref, b1d_ref,        # decoder layer 1
                w2d_ref, b2d_ref,        # decoder layer 2 (unpadded output)
                out_ref):
    f32 = jnp.float32
    cdt = w1_ref.dtype                               # matmul compute dtype (bf16)

    ctrl = ctrl_ref[...].astype(f32)                 # (TB, C) full-precision FiLM operand
    din = din_ref[...].astype(cdt)                   # (TB, drug_dim+1) cast in-kernel
    C = ctrl.shape[-1]

    # ---- fused gamma|beta branch: Linear -> ReLU -> Linear -------------------
    h = jnp.dot(din, w1_ref[...], preferred_element_type=f32) + b1_ref[...]   # (TB, 2H)
    h = jnp.maximum(h, 0.0)

    # block-diagonal fused second layer; each half starts on a 128-lane boundary
    gb = jnp.dot(h.astype(cdt), w2_ref[...], preferred_element_type=f32) + b2_ref[...]
    c_pad = gb.shape[-1] // 2
    gamma = gb[:, :C]                                 # starts at lane 0 (free view)
    beta = gb[:, c_pad:c_pad + C]                     # starts at lane-tile boundary

    # ---- FiLM modulation (f32 VPU) --------------------------------------------
    modulated = gamma * ctrl + beta                   # (TB, C)

    # ---- decoder: Linear -> ReLU -> Linear ------------------------------------
    hd = jnp.dot(modulated.astype(cdt), w1d_ref[...],
                 preferred_element_type=f32) + b1d_ref[...]                    # (TB, H)
    hd = jnp.maximum(hd, 0.0)
    treated = jnp.dot(hd.astype(cdt), w2d_ref[...],
                      preferred_element_type=f32) + b2d_ref[...]               # (TB, out)

    out_ref[...] = treated.astype(out_ref.dtype)


def _prepare_kernel_params(params, compute_dtype):
    """Fuse the gamma/beta branches with lane-tile-aligned layout."""
    f32 = jnp.float32
    hidden = params["w1g"].shape[1]
    control_dim = params["w2g"].shape[1]
    c_pad = 128 * pl.cdiv(control_dim, 128)           # lane-tile aligned half width

    # layer 1: column concat -> h[:, :H] = gamma hidden, h[:, H:] = beta hidden
    w1 = jnp.concatenate([params["w1g"], params["w1b"]], axis=1)   # (drug_dim+1, 2H)
    b1 = jnp.concatenate([params["b1g"], params["b1b"]], axis=1)   # (1, 2H)

    # layer 2: block-diagonal so one matmul feeds both branches; each branch's
    # output block starts on a 128-lane boundary (free static slice in-kernel).
    w2 = jnp.zeros((2 * hidden, 2 * c_pad), f32)
    w2 = w2.at[:hidden, :control_dim].set(params["w2g"])
    w2 = w2.at[hidden:, c_pad:c_pad + control_dim].set(params["w2b"])
    b2 = jnp.zeros((1, 2 * c_pad), f32)
    b2 = b2.at[:, :control_dim].set(params["b2g"])
    b2 = b2.at[:, c_pad:c_pad + control_dim].set(params["b2b"])

    return dict(
        w1=w1.astype(compute_dtype), b1=b1.astype(f32),
        w2=w2.astype(compute_dtype), b2=b2.astype(f32),
        w1d=params["w1d"].astype(compute_dtype), b1d=params["b1d"].astype(f32),
        w2d=params["w2d"].astype(compute_dtype), b2d=params["b2d"].astype(f32),
    )


def film_forward(control_emb, drug_emb, logdose, params, *,
                 tile_b=256, compute_dtype=jnp.bfloat16, out_dtype=jnp.bfloat16):
    B, control_dim = control_emb.shape
    drug_dim = drug_emb.shape[1]
    hidden_dim = params["w1g"].shape[1]
    output_dim = params["w2d"].shape[1]

    kp = _prepare_kernel_params(params, compute_dtype)
    c_pad2 = kp["w2"].shape[1]                         # 2 * c_pad

    # Batch tile: multiple of 16 rows (bf16 sublane packing), capped at the
    # requested tile and at the (16-rounded) batch so padding stays small.
    row_q = 16
    tile_b = max(row_q, min(_round_up(tile_b, row_q), _round_up(B, row_q)))
    b_pad = _round_up(B, tile_b)

    # logdose folded back as the last drug-input column (matches torch.cat);
    # no wrapper-side bf16 cast — activations stream to the kernel in f32.
    din = jnp.concatenate([drug_emb, logdose], axis=-1).astype(control_emb.dtype)

    if b_pad != B:
        pad = b_pad - B
        control_emb = jnp.pad(control_emb, ((0, pad), (0, 0)))
        din = jnp.pad(din, ((0, pad), (0, 0)))

    grid = (b_pad // tile_b,)

    def batch_spec(feat):
        return pl.BlockSpec((tile_b, feat), lambda i: (i, 0))

    def const_spec(arr):
        # Full-array block, constant index -> DMA'd once, resident in VMEM.
        return pl.BlockSpec(arr.shape, lambda i: (0, 0))

    in_specs = [
        batch_spec(control_dim),
        batch_spec(drug_dim + 1),
        const_spec(kp["w1"]), const_spec(kp["b1"]),
        const_spec(kp["w2"]), const_spec(kp["b2"]),
        const_spec(kp["w1d"]), const_spec(kp["b1d"]),
        const_spec(kp["w2d"]), const_spec(kp["b2d"]),
    ]
    out_specs = pl.BlockSpec((tile_b, output_dim), lambda i: (i, 0))

    # Advisory cost estimate so XLA schedules this small custom call sanely.
    flops = 2 * b_pad * ((drug_dim + 1) * 2 * hidden_dim
                         + 2 * hidden_dim * c_pad2
                         + control_dim * hidden_dim
                         + hidden_dim * output_dim)
    bytes_accessed = (
        b_pad * control_dim * control_emb.dtype.itemsize
        + b_pad * (drug_dim + 1) * din.dtype.itemsize
        + sum(int(v.size) * v.dtype.itemsize for v in kp.values())
        + b_pad * output_dim * jnp.dtype(out_dtype).itemsize)

    out = pl.pallas_call(
        film_kernel,
        out_shape=jax.ShapeDtypeStruct((b_pad, output_dim), out_dtype),
        grid=grid,
        in_specs=in_specs,
        out_specs=out_specs,
        compiler_params=pltpu.CompilerParams(dimension_semantics=("parallel",)),
        cost_estimate=pl.CostEstimate(flops=int(flops), transcendentals=0,
                                      bytes_accessed=int(bytes_accessed)),
    )(control_emb, din,
      kp["w1"], kp["b1"], kp["w2"], kp["b2"],
      kp["w1d"], kp["b1d"], kp["w2d"], kp["b2d"])

    return out[:B]


def init_params(key, control_dim, drug_dim, hidden_dim, output_dim):
    """Deterministic init mimicking nn.Linear (uniform +-1/sqrt(fan_in)).
    Weights stored as (in_features, out_features) so y = x @ W + b."""
    def linear(key, fan_in, fan_out):
        kw, kb = jax.random.split(key)
        bound = 1.0 / jnp.sqrt(fan_in)
        w = jax.random.uniform(kw, (fan_in, fan_out), jnp.float32, -bound, bound)
        b = jax.random.uniform(kb, (1, fan_out), jnp.float32, -bound, bound)
        return w, b

    keys = jax.random.split(key, 6)
    w1g, b1g = linear(keys[0], drug_dim + 1, hidden_dim)
    w2g, b2g = linear(keys[1], hidden_dim, control_dim)
    w1b, b1b = linear(keys[2], drug_dim + 1, hidden_dim)
    w2b, b2b = linear(keys[3], hidden_dim, control_dim)
    w1d, b1d = linear(keys[4], control_dim, hidden_dim)
    w2d, b2d = linear(keys[5], hidden_dim, output_dim)
    return dict(w1g=w1g, b1g=b1g, w2g=w2g, b2g=b2g,
                w1b=w1b, b1b=b1b, w2b=w2b, b2b=b2b,
                w1d=w1d, b1d=b1d, w2d=w2d, b2d=b2d)


def film_reference(control_emb, drug_emb, logdose, p):
    """Pure-JAX f32 reference matching the PyTorch forward, for validation."""
    din = jnp.concatenate([drug_emb, logdose], axis=-1)
    gamma = jnp.maximum(din @ p["w1g"] + p["b1g"], 0.0) @ p["w2g"] + p["b2g"]
    beta = jnp.maximum(din @ p["w1b"] + p["b1b"], 0.0) @ p["w2b"] + p["b2b"]
    mod = gamma * control_emb + beta
    return jnp.maximum(mod @ p["w1d"] + p["b1d"], 0.0) @ p["w2d"] + p["b2d"]


if __name__ == "__main__":
    batch = 8
    control_dim = 32
    drug_dim = 8
    hidden_dim = 32
    output_dim = 32

    key = jax.random.PRNGKey(0)
    k_ctrl, k_drug, k_dose, k_params = jax.random.split(key, 4)

    control_emb = jax.random.normal(k_ctrl, (batch, control_dim), jnp.float32)
    drug_emb = jax.random.normal(k_drug, (batch, drug_dim), jnp.float32)
    logdose = jax.random.normal(k_dose, (batch, 1), jnp.float32)

    params = init_params(k_params, control_dim, drug_dim, hidden_dim, output_dim)

    out = film_forward(control_emb, drug_emb, logdose, params)
    out = jax.block_until_ready(out)

    ref = film_reference(control_emb, drug_emb, logdose, params)
    assert out.shape == (batch, output_dim)
    # bf16 matmul operands + bf16 output with f32 accumulation -> relaxed tolerance.
    assert jnp.allclose(out.astype(jnp.float32), ref, atol=5e-2, rtol=5e-2), \
        "kernel/reference mismatch"

    print("KERNEL_OK")
</pallas_src>

<mosaic_0001>
module attributes {stable_mosaic.version = 11 : i64} {
  func.func @film_kernel(%arg0: i32, %arg1: memref<16x32xf32, #tpu.memory_space<vmem>>, %arg2: memref<16x9xf32, #tpu.memory_space<vmem>>, %arg3: memref<9x64xbf16, #tpu.memory_space<vmem>>, %arg4: memref<1x64xf32, #tpu.memory_space<vmem>>, %arg5: memref<64x256xbf16, #tpu.memory_space<vmem>>, %arg6: memref<1x256xf32, #tpu.memory_space<vmem>>, %arg7: memref<32x32xbf16, #tpu.memory_space<vmem>>, %arg8: memref<1x32xf32, #tpu.memory_space<vmem>>, %arg9: memref<32x32xbf16, #tpu.memory_space<vmem>>, %arg10: memref<1x32xf32, #tpu.memory_space<vmem>>, %arg11: memref<16x32xbf16, #tpu.memory_space<vmem>>) attributes {dimension_semantics = [#tpu.dimension_semantics<parallel>], iteration_bounds = array<i64: 1>, scalar_prefetch = 0 : i64, scratch_operands = 0 : i64, tpu.core_type = #tpu.core_type<tc>, window_params = [{transform_indices = @transform_0, window_bounds = array<i64: 16, 32>}, {transform_indices = @transform_1, window_bounds = array<i64: 16, 9>}, {pipeline_mode = #tpu.pipeline_mode<synchronous>, transform_indices = @transform_2, window_bounds = array<i64: 9, 64>}, {pipeline_mode = #tpu.pipeline_mode<synchronous>, transform_indices = @transform_3, window_bounds = array<i64: 1, 64>}, {pipeline_mode = #tpu.pipeline_mode<synchronous>, transform_indices = @transform_4, window_bounds = array<i64: 64, 256>}, {pipeline_mode = #tpu.pipeline_mode<synchronous>, transform_indices = @transform_5, window_bounds = array<i64: 1, 256>}, {pipeline_mode = #tpu.pipeline_mode<synchronous>, transform_indices = @transform_6, window_bounds = array<i64: 32, 32>}, {pipeline_mode = #tpu.pipeline_mode<synchronous>, transform_indices = @transform_7, window_bounds = array<i64: 1, 32>}, {pipeline_mode = #tpu.pipeline_mode<synchronous>, transform_indices = @transform_8, window_bounds = array<i64: 32, 32>}, {pipeline_mode = #tpu.pipeline_mode<synchronous>, transform_indices = @transform_9, window_bounds = array<i64: 1, 32>}, {transform_indices = @transform_10, window_bounds = array<i64: 16, 32>}]} {
    %c0 = arith.constant 0 : index
    %c0_0 = arith.constant 0 : index
    %0 = vector.load %arg1[%c0, %c0_0] : memref<16x32xf32, #tpu.memory_space<vmem>>, vector<16x32xf32>
    %c0_1 = arith.constant 0 : index
    %c0_2 = arith.constant 0 : index
    %1 = vector.load %arg2[%c0_1, %c0_2] : memref<16x9xf32, #tpu.memory_space<vmem>>, vector<16x9xf32>
    %2 = arith.truncf %1 : vector<16x9xf32> to vector<16x9xbf16>
    %c0_3 = arith.constant 0 : index
    %c0_4 = arith.constant 0 : index
    %3 = vector.load %arg3[%c0_3, %c0_4] : memref<9x64xbf16, #tpu.memory_space<vmem>>, vector<9x64xbf16>
    %cst = arith.constant dense<0.000000e+00> : vector<16x64xf32>
    %4 = tpu.matmul %2, %3, %cst {dimension_numbers = #tpu.dot_dimension_numbers<[1], [0], [0], [1], [0, 0, 1, 1], [], []>} : vector<16x9xbf16>, vector<9x64xbf16>, vector<16x64xf32> -> vector<16x64xf32>
    %c0_5 = arith.constant 0 : index
    %c0_6 = arith.constant 0 : index
    %5 = vector.load %arg4[%c0_5, %c0_6] : memref<1x64xf32, #tpu.memory_space<vmem>>, vector<1x64xf32>
    %6 = vector.broadcast %5 : vector<1x64xf32> to vector<16x64xf32>
    %7 = arith.addf %4, %6 : vector<16x64xf32>
    %cst_7 = arith.constant 0.000000e+00 : f32
    %8 = vector.broadcast %cst_7 : f32 to vector<16x64xf32>
    %9 = arith.maximumf %7, %8 : vector<16x64xf32>
    %10 = arith.truncf %9 : vector<16x64xf32> to vector<16x64xbf16>
    %c0_8 = arith.constant 0 : index
    %c0_9 = arith.constant 0 : index
    %11 = vector.load %arg5[%c0_8, %c0_9] : memref<64x256xbf16, #tpu.memory_space<vmem>>, vector<64x256xbf16>
    %cst_10 = arith.constant dense<0.000000e+00> : vector<16x256xf32>
    %12 = tpu.matmul %10, %11, %cst_10 {dimension_numbers = #tpu.dot_dimension_numbers<[1], [0], [0], [1], [0, 0, 1, 1], [], []>} : vector<16x64xbf16>, vector<64x256xbf16>, vector<16x256xf32> -> vector<16x256xf32>
    %c0_11 = arith.constant 0 : index
    %c0_12 = arith.constant 0 : index
    %13 = vector.load %arg6[%c0_11, %c0_12] : memref<1x256xf32, #tpu.memory_space<vmem>>, vector<1x256xf32>
    %14 = vector.broadcast %13 : vector<1x256xf32> to vector<16x256xf32>
    %15 = arith.addf %12, %14 : vector<16x256xf32>
    %16 = vector.extract_strided_slice %15 {offsets = [0, 0], sizes = [16, 32], strides = [1, 1]} : vector<16x256xf32> to vector<16x32xf32>
    %17 = vector.extract_strided_slice %15 {offsets = [0, 128], sizes = [16, 32], strides = [1, 1]} : vector<16x256xf32> to vector<16x32xf32>
    %18 = arith.mulf %16, %0 : vector<16x32xf32>
    %19 = arith.addf %18, %17 : vector<16x32xf32>
    %20 = arith.truncf %19 : vector<16x32xf32> to vector<16x32xbf16>
    %c0_13 = arith.constant 0 : index
    %c0_14 = arith.constant 0 : index
    %21 = vector.load %arg7[%c0_13, %c0_14] : memref<32x32xbf16, #tpu.memory_space<vmem>>, vector<32x32xbf16>
    %cst_15 = arith.constant dense<0.000000e+00> : vector<16x32xf32>
    %22 = tpu.matmul %20, %21, %cst_15 {dimension_numbers = #tpu.dot_dimension_numbers<[1], [0], [0], [1], [0, 0, 1, 1], [], []>} : vector<16x32xbf16>, vector<32x32xbf16>, vector<16x32xf32> -> vector<16x32xf32>
    %c0_16 = arith.constant 0 : index
    %c0_17 = arith.constant 0 : index
    %23 = vector.load %arg8[%c0_16, %c0_17] : memref<1x32xf32, #tpu.memory_space<vmem>>, vector<1x32xf32>
    %24 = vector.broadcast %23 : vector<1x32xf32> to vector<16x32xf32>
    %25 = arith.addf %22, %24 : vector<16x32xf32>
    %cst_18 = arith.constant 0.000000e+00 : f32
    %26 = vector.broadcast %cst_18 : f32 to vector<16x32xf32>
    %27 = arith.maximumf %25, %26 : vector<16x32xf32>
    %28 = arith.truncf %27 : vector<16x32xf32> to vector<16x32xbf16>
    %c0_19 = arith.constant 0 : index
    %c0_20 = arith.constant 0 : index
    %29 = vector.load %arg9[%c0_19, %c0_20] : memref<32x32xbf16, #tpu.memory_space<vmem>>, vector<32x32xbf16>
    %cst_21 = arith.constant dense<0.000000e+00> : vector<16x32xf32>
    %30 = tpu.matmul %28, %29, %cst_21 {dimension_numbers = #tpu.dot_dimension_numbers<[1], [0], [0], [1], [0, 0, 1, 1], [], []>} : vector<16x32xbf16>, vector<32x32xbf16>, vector<16x32xf32> -> vector<16x32xf32>
    %c0_22 = arith.constant 0 : index
    %c0_23 = arith.constant 0 : index
    %31 = vector.load %arg10[%c0_22, %c0_23] : memref<1x32xf32, #tpu.memory_space<vmem>>, vector<1x32xf32>
    %32 = vector.broadcast %31 : vector<1x32xf32> to vector<16x32xf32>
    %33 = arith.addf %30, %32 : vector<16x32xf32>
    %34 = arith.truncf %33 : vector<16x32xf32> to vector<16x32xbf16>
    %c0_24 = arith.constant 0 : index
    %c0_25 = arith.constant 0 : index
    %35 = vector.load %arg11[%c0_24, %c0_25] : memref<16x32xbf16, #tpu.memory_space<vmem>>, vector<16x32xbf16>
    tpu.vector_store %arg11[%c0_24, %c0_25], %34 {strides = array<i32>} : memref<16x32xbf16, #tpu.memory_space<vmem>>, vector<16x32xbf16>,
    return
  }
  func.func @transform_0(%arg0: i32) -> (i32, i32) {
    %c0_i32 = arith.constant 0 : i32
    %c0_i32_0 = arith.constant 0 : i32
    return %arg0, %c0_i32 : i32, i32
  }
  func.func @transform_1(%arg0: i32) -> (i32, i32) {
    %c0_i32 = arith.constant 0 : i32
    %c0_i32_0 = arith.constant 0 : i32
    return %arg0, %c0_i32 : i32, i32
  }
  func.func @transform_2(%arg0: i32) -> (i32, i32) {
    %c0_i32 = arith.constant 0 : i32
    %c0_i32_0 = arith.constant 0 : i32
    %c0_i32_1 = arith.constant 0 : i32
    return %c0_i32, %c0_i32_0 : i32, i32
  }
  func.func @transform_3(%arg0: i32) -> (i32, i32) {
    %c0_i32 = arith.constant 0 : i32
    %c0_i32_0 = arith.constant 0 : i32
    %c0_i32_1 = arith.constant 0 : i32
    return %c0_i32, %c0_i32_0 : i32, i32
  }
  func.func @transform_4(%arg0: i32) -> (i32, i32) {
    %c0_i32 = arith.constant 0 : i32
    %c0_i32_0 = arith.constant 0 : i32
    %c0_i32_1 = arith.constant 0 : i32
    return %c0_i32, %c0_i32_0 : i32, i32
  }
  func.func @transform_5(%arg0: i32) -> (i32, i32) {
    %c0_i32 = arith.constant 0 : i32
    %c0_i32_0 = arith.constant 0 : i32
    %c0_i32_1 = arith.constant 0 : i32
    return %c0_i32, %c0_i32_0 : i32, i32
  }
  func.func @transform_6(%arg0: i32) -> (i32, i32) {
    %c0_i32 = arith.constant 0 : i32
    %c0_i32_0 = arith.constant 0 : i32
    %c0_i32_1 = arith.constant 0 : i32
    return %c0_i32, %c0_i32_0 : i32, i32
  }
  func.func @transform_7(%arg0: i32) -> (i32, i32) {
    %c0_i32 = arith.constant 0 : i32
    %c0_i32_0 = arith.constant 0 : i32
    %c0_i32_1 = arith.constant 0 : i32
    return %c0_i32, %c0_i32_0 : i32, i32
  }
  func.func @transform_8(%arg0: i32) -> (i32, i32) {
    %c0_i32 = arith.constant 0 : i32
    %c0_i32_0 = arith.constant 0 : i32
    %c0_i32_1 = arith.constant 0 : i32
    return %c0_i32, %c0_i32_0 : i32, i32
  }
  func.func @transform_9(%arg0: i32) -> (i32, i32) {
    %c0_i32 = arith.constant 0 : i32
    %c0_i32_0 = arith.constant 0 : i32
    %c0_i32_1 = arith.constant 0 : i32
    return %c0_i32, %c0_i32_0 : i32, i32
  }
  func.func @transform_10(%arg0: i32) -> (i32, i32) {
    %c0_i32 = arith.constant 0 : i32
    %c0_i32_0 = arith.constant 0 : i32
    return %arg0, %c0_i32 : i32, i32
  }
}

</mosaic_0001>

<bundles_post_ra>
// kernel: tpu_custom_call.1
= control target key start
LH: loop header
LB: loop body
LE: loop exit
PB: predicated region body
PF: predicated region fallthrough
CT: control target
= control target key end

     0   :  { %15 = vsyncpa [#allocation3], 0  ;;  %s838_s0 = inlined_call_operand.hbm [shape: f32[16,32], index: 0, kind: input, shape index: {}]   ;;  %s839_s1 = inlined_call_operand.hbm [shape: f32[16,9], index: 1, kind: input, shape index: {}]   ;;  %s840_s2 = inlined_call_operand.hbm [shape: bf16[9,64], index: 2, kind: input, shape index: {}]   ;;  %s841_s3 = inlined_call_operand.vmem [shape: f32[1,64], index: 3, kind: input, shape index: {}]   ;;  %s842_s4 = inlined_call_operand.hbm [shape: bf16[64,256], index: 4, kind: input, shape index: {}]   ;;  %s843_s5 = inlined_call_operand.vmem [shape: f32[1,256], index: 5, kind: input, shape index: {}]   ;;  %s844_s6 = inlined_call_operand.hbm [shape: bf16[32,32], index: 6, kind: input, shape index: {}]   ;;  %s845_s7 = inlined_call_operand.vmem [shape: f32[1,32], index: 7, kind: input, shape index: {}]   ;;  %s846_s8 = inlined_call_operand.hbm [shape: bf16[32,32], index: 8, kind: input, shape index: {}]   ;;  %s847_s9 = inlined_call_operand.vmem [shape: f32[1,32], index: 9, kind: input, shape index: {}]   ;;  %s848_s10 = inlined_call_operand.hbm [shape: bf16[16,32], index: 10, kind: output, shape index: {}]  }
   0x1   :  { %16 = vsyncpa [#allocation6], 0 }
   0x2   :  { %17 = vsyncpa [#allocation9], 0 }
   0x3   :  { %18 = vsyncpa [#allocation12], 0 }
   0x4   :  { %19 = vsyncpa [#allocation4], 0  ;;  %s710_s13 = smov [#allocation5]   ;;  %s711_s15 = smov [#allocation8]  }
   0x5   :  { %s37_s14 = sshll.u32 %s710_s13, 4  ;;  %s63_s16 = sshll.u32 %s711_s15, 4  ;;  %s38_s14 = int_to_ptr.vmem [resolvable:$true] %s37_s14  ;;  %s64_s16 = int_to_ptr.vmem [resolvable:$true] %s63_s16 }
   0x6   :  { %s568_s17 = scalar_lea.vmem %s38_s14, 256  ;;  %p573_p1 = scmp.lt.s32.totalorder %s38_s14, %s38_s14 }
   0x7   :  { %p569_p0 = scmp.ne.s32.totalorder %s38_s14, %s568_s17  ;;  %p574_p2 = scmp.lt.s32.totalorder %s568_s17, %s568_s17 }
   0x9   :  { %p575_p3 = por %p574_p2, %p573_p1 }
   0xb   :  { %p576_p4 = pnand %p575_p3, %p569_p0 }
   0xd   :  { %579 = shalt.err (!%p576_p4)
}
   0xe   :  { %s712_s18 = smov 128   ;;  %s713_s19 = smov 8  }
   0xf   :  { %43 = dma.hbm_to_vmem [thread:$0]  %s839_s1, 256, %s38_s14, [#allocation6], %s712_s18, %s712_s18, %s713_s19  }
  0x10   :  { %s588_s22 = scalar_lea.vmem %s64_s16, 1024  ;;  %p593_p6 = scmp.lt.s32.totalorder %s64_s16, %s64_s16 }
  0x11   :  { %p589_p5 = scmp.ne.s32.totalorder %s64_s16, %s588_s22  ;;  %p594_p7 = scmp.lt.s32.totalorder %s588_s22, %s588_s22 }
  0x13   :  { %p595_p8 = por %p594_p7, %p593_p6 }
  0x15   :  { %p596_p9 = pnand %p595_p8, %p589_p5 }
  0x17   :  { %599 = shalt.err (!%p596_p9)
}
  0x18   :  { %69 = dma.hbm_to_vmem [thread:$0]  %s842_s4, 1024, %s64_s16, [#allocation9], %s712_s18, %s712_s18, %s713_s19  }
  0x19   :  { %s714_s25 = smov [#allocation2]   ;;  %s715_s27 = smov [#allocation7]  }
  0x1a   :  { %s25_s26 = sshll.u32 %s714_s25, 4  ;;  %s49_s28 = sshll.u32 %s715_s27, 4  ;;  %s26_s26 = int_to_ptr.vmem [resolvable:$true] %s25_s26  ;;  %s50_s28 = int_to_ptr.vmem [resolvable:$true] %s49_s28 }
  0x1b   :  { %s608_s29 = scalar_lea.vmem %s26_s26, 256  ;;  %p613_p11 = scmp.lt.s32.totalorder %s26_s26, %s26_s26 }
  0x1c   :  { %p609_p10 = scmp.ne.s32.totalorder %s26_s26, %s608_s29  ;;  %p614_p12 = scmp.lt.s32.totalorder %s608_s29, %s608_s29 }
  0x1e   :  { %p615_p13 = por %p614_p12, %p613_p11 }
  0x20   :  { %p616_p0 = pnand %p615_p13, %p609_p10 }
  0x22   :  { %619 = shalt.err (!%p616_p0)
}
  0x23   :  { %31 = dma.hbm_to_vmem [thread:$0]  %s838_s0, 256, %s26_s26, [#allocation3], %s712_s18, %s712_s18, %s713_s19  }
  0x24   :  { %s628_s11 = scalar_lea.vmem %s50_s28, 128  ;;  %p633_p2 = scmp.lt.s32.totalorder %s50_s28, %s50_s28 }
  0x25   :  { %p629_p1 = scmp.ne.s32.totalorder %s50_s28, %s628_s11  ;;  %p634_p3 = scmp.lt.s32.totalorder %s628_s11, %s628_s11 }
  0x27   :  { %p635_p4 = por %p634_p3, %p633_p2 }
  0x29   :  { %p636_p5 = pnand %p635_p4, %p629_p1 }
  0x2b   :  { %639 = shalt.err (!%p636_p5)
}
  0x2c   :  { %s716_s4 = smov 64   ;;  %s717_s12 = smov 4  }
  0x2d   :  { %55 = dma.hbm_to_vmem [thread:$0]  %s840_s2, 128, %s50_s28, [#allocation6], %s716_s4, %s716_s4, %s717_s12  }
  0x2e   :  { %s718_s15 = smov [#allocation10]   ;;  %s719_s17 = smov [#allocation11]  }
  0x2f   :  { %s77_s16 = sshll.u32 %s718_s15, 4  ;;  %s91_s0 = sshll.u32 %s719_s17, 4  ;;  %s78_s16 = int_to_ptr.vmem [resolvable:$true] %s77_s16  ;;  %s92_s0 = int_to_ptr.vmem [resolvable:$true] %s91_s0 }
  0x30   :  { %s648_s18 = scalar_lea.vmem %s78_s16, 256  ;;  %p653_p7 = scmp.lt.s32.totalorder %s78_s16, %s78_s16 }
  0x31   :  { %p649_p6 = scmp.ne.s32.totalorder %s78_s16, %s648_s18  ;;  %p654_p8 = scmp.lt.s32.totalorder %s648_s18, %s648_s18 }
  0x33   :  { %p655_p9 = por %p654_p8, %p653_p7 }
  0x35   :  { %p656_p10 = pnand %p655_p9, %p649_p6 }
  0x37   :  { %659 = shalt.err (!%p656_p10)
}
  0x38   :  { %83 = dma.hbm_to_vmem [thread:$0]  %s844_s6, 256, %s78_s16, [#allocation9], %s716_s4, %s716_s4, %s717_s12  }
  0x39   :  { %s668_s2 = scalar_lea.vmem %s92_s0, 256  ;;  %p673_p12 = scmp.lt.s32.totalorder %s92_s0, %s92_s0 }
  0x3a   :  { %p669_p11 = scmp.ne.s32.totalorder %s92_s0, %s668_s2  ;;  %p674_p13 = scmp.lt.s32.totalorder %s668_s2, %s668_s2 }
  0x3c   :  { %p675_p0 = por %p674_p13, %p673_p12 }
  0x3e   :  { %p676_p1 = pnand %p675_p0, %p669_p11 }
  0x40   :  { %679 = shalt.err (!%p676_p1)
}
  0x41   :  { %97 = dma.hbm_to_vmem [thread:$0]  %s846_s8, 256, %s92_s0, [#allocation12], %s716_s4, %s716_s4, %s717_s12  }
  0x42   :  { %700 = dma.done.wait [#allocation3], 256  }
  0x43   :  { %701 = vsyncadd [#allocation3], 4294967040 }
  0x44   :  { %702 = dma.done.wait [#allocation6], 384  }
  0x45   :  { %703 = vsyncadd [#allocation6], 4294966912 }
  0x46   :  { %704 = dma.done.wait [#allocation9], 1280  }
  0x47   :  { %705 = vsyncadd [#allocation9], 4294966016 }
  0x48   :  { %706 = dma.done.wait [#allocation12], 256  }
  0x49   :  { %707 = vsyncadd [#allocation12], 4294967040  ;;  %vm142_vm0 = vcmask 1043456   ;;  %v720_v0 = vmov 0.0   ;;  %vm721_vm1 = vmmov 0   ;;  %vm143_vm2 = vcmask 1044480  }
  0x4a   :  { %506 = vmatprep.subr.bf16.mxu0 %v720_v0  ;;  %508 = vmatprep.mubr.msk.bf16.mxu0 %vm721_vm1, %v720_v0  ;;  %v722_v1 = vmov 65535   ;;  %v543_v4 = vld [vmem:[#allocation7] sm:$0x1f]   ;;  %v121_v5 = vld [vmem:[#allocation5] sm:$0xff]  ;;  %v122_v6 = vld [vmem:[#allocation5 + $0x8] sm:$0xff]  ;;  %vm138_vm3 = vcmask 72704   ;;  %v203_v30 = vlaneseq }
  0x4b   :  { %v144_v2 = vsel %vm142_vm0, 4294967295, %v722_v1  ;;  %v544_v8 = vld [vmem:[#allocation8 + $0x34] ss:$8 sps:$4 sm:$0xff]   ;;  %v546_v9 = vld [vmem:[#allocation8 + $0x30] ss:$8 sps:$4 sm:$0xff]   ;;  %v123_v10 = vpack.c.bf16 %v122_v6, %v121_v5  ;;  %v723_v17 = vmov 0  }
  0x4c   :  { %v145_v3 = vsel %vm143_vm2, %v144_v2, 0  ;;  %v547_v11 = vld [vmem:[#allocation8 + $0x24] ss:$8 sps:$4 sm:$0xff]   ;;  %265 = vmatprep.subr.bf16.mxu1 %v544_v8  ;;  %v549_v12 = vld [vmem:[#allocation8 + $0x20] ss:$8 sps:$4 sm:$0xff]   ;;  %289 = vmatprep.mubr.bf16.mxu1 %v723_v17  ;;  %vm253_vm4 = vcmask 523264  }
  0x4d   :  { %v147_v7 = vand.u32 %v543_v4, %v145_v3  ;;  %266 = vmatpush1.bf16.msra.mxu1 %v546_v9  ;;  %v550_v13 = vld [vmem:[#allocation8 + $0x14] ss:$8 sps:$4 sm:$0xff]   ;;  %v552_v14 = vld [vmem:[#allocation8 + $0x10] ss:$8 sps:$4 sm:$0xff]   ;;  %v553_v15 = vld [vmem:[#allocation8 + $0x4] ss:$8 sps:$4 sm:$0xff]  }
  0x4e   :  { %267 = vmatprep.subr.bf16.mxu1 %v547_v11  ;;  %v555_v16 = vld [vmem:[#allocation8] ss:$8 sps:$4 sm:$0xff]   ;;  %v474_v18 = vld [vmem:[%s841_s3] ss:$0 sm:$0xff]  ;;  %v204_v31 = vshrl.u32 %v203_v30, 7  ;;  %vm328_vm5 = vcmask 261120  }
  0x4f   :  { %507 = vmatpush3.bf16.msra.mxu0 %v147_v7  ;;  %v556_v28 = vld [vmem:[#allocation10 + $0x8] sm:$0xff]   ;;  %v557_v29 = vld [vmem:[#allocation10] sm:$0xff]   ;;  %v201_v33 = vld [vmem:[%s843_s5] sm:$0x3]  ;;  %vm451_vm6 = vcmask 257024  }
  0x50   :  { %512 = vmatprep.subr.bf16.mxu0 %v720_v0  ;;  %v205_v32 = vsub.s32 0, %v204_v31  ;;  %v209_v35 = vsub.s32 1, %v204_v31  ;;  %v119_v39 = vld [vmem:[#allocation2] sm:$0xff]  ;;  %v120_v41 = vld [vmem:[#allocation2 + $0x8] sm:$0xff]  ;;  %v559_v53 = vld [vmem:[#allocation11] sm:$0xff]  }
  0x51   :  { %268 = vmatpush1.bf16.msra.mxu1 %v549_v12  ;;  %v558_v52 = vld [vmem:[#allocation11 + $0x8] sm:$0xff]  }
  0x52   :  { %509 = vmatmul.mubr.msk.bf16.vlgmr.msra.gmra.mxu0 %vm138_vm3, %v123_v10  ;;  %269 = vmatprep.subr.bf16.mxu1 %v550_v13  ;;  %v206_v34 = vrot.slane %v201_v33, %v205_v32  ;;  %v210_v38 = vrot.slane %v201_v33, %v209_v35  ;;  %v486_v54 = vld [vmem:[%s845_s7] ss:$0 sm:$0xff]  ;;  %s724_s7 = smov [#allocation13]  }
  0x53   :  { %516 = vmatprep.mubr.msk.bf16.mxu0 %vm721_vm1, %v720_v0  ;;  %513 = vmatpush3.bf16.msra.mxu0 %v556_v28  ;;  %s459_s27 = sshll.u32 %s724_s7, 4  ;;  %s460_s27 = int_to_ptr.vmem [resolvable:$true] %s459_s27 }
  0x54   :  { %514 = vmatprep.subr.bf16.mxu0 %v720_v0  ;;  %s680_s28 = scalar_lea.vmem %s460_s27, 128  ;;  %p685_p3 = scmp.lt.s32.totalorder %s460_s27, %s460_s27 }
  0x55   :  { %270 = vmatpush1.bf16.msra.mxu1 %v552_v14  ;;  %p681_p2 = scmp.ne.s32.totalorder %s460_s27, %s680_s28  ;;  %p686_p4 = scmp.lt.s32.totalorder %s680_s28, %s680_s28 }
  0x56   :  { %271 = vmatprep.subr.bf16.mxu1 %v553_v15 }
  0x57   :  { %515 = vmatpush3.bf16.msra.mxu0 %v557_v29  ;;  %p687_p5 = por %p686_p4, %p685_p3 }
  0x58   :  { %520 = vmatprep.subr.bf16.mxu0 %v720_v0 }
  0x59   :  { %272 = vmatpush1.bf16.msra.mxu1 %v555_v16  ;;  %p688_p6 = pnand %p687_p5, %p681_p2 }
 0x112   :  { %v183_v19 = vpop.f32.mrf.mxu0 }
 0x113   :  { %v184_v21 = vadd.f32 %v474_v18, %v183_v19 }
 0x114   :  { %v510_v20 = vpop.f32.mrf.mxu0 }
 0x115   :  { %v190_v25 = vmax.f32 %v184_v21, 0.0 }
 0x116   :  { %v186_v22 = vpop.f32.mrf.mxu0 }
 0x117   :  { %v187_v23 = vadd.f32 %v474_v18, %v186_v22 }
 0x118   :  { %v511_v24 = vpop.f32.mrf.mxu0 }
 0x119   :  { %v191_v26 = vmax.f32 %v187_v23, 0.0 }
 0x11b   :  { %v192_v27 = vpack.c.bf16 %v191_v26, %v190_v25 }
 0x11d   :  { %485 = vmatmul.mubr.msk.bf16.vlgmr.msra.gmra.mxu1 %vm253_vm4, %v192_v27 }
 0x1dd   :  { %v291_v36 = vpop.f32.mrf.mxu1 }
 0x1de   :  { %v292_v37 = vadd.f32 %v291_v36, %v206_v34 }
 0x1df   :  { %v293_v40 = vpop.f32.mrf.mxu1 }
 0x1e0   :  { %v300_v43 = vmul.f32 %v292_v37, %v119_v39  ;;  %v294_v44 = vadd.f32 %v293_v40, %v210_v38 }
 0x1e1   :  { %v295_v42 = vpop.f32.mrf.mxu1 }
 0x1e2   :  { %v296_v45 = vadd.f32 %v295_v42, %v206_v34  ;;  %v302_v49 = vadd.f32 %v300_v43, %v294_v44 }
 0x1e3   :  { %v297_v46 = vpop.f32.mrf.mxu1 }
 0x1e4   :  { %v301_v47 = vmul.f32 %v296_v45, %v120_v41  ;;  %v298_v48 = vadd.f32 %v297_v46, %v210_v38 }
 0x1e6   :  { %v303_v50 = vadd.f32 %v301_v47, %v298_v48 }
 0x1e8   :  { %v304_v51 = vpack.c.bf16 %v303_v50, %v302_v49 }
 0x1ea   :  { %517 = vmatmul.mubr.msk.bf16.vlgmr.msra.gmra.mxu0 %vm328_vm5, %v304_v51 }
 0x1eb   :  { %524 = vmatprep.mubr.msk.bf16.mxu0 %vm721_vm1, %v720_v0  ;;  %521 = vmatpush3.bf16.msra.mxu0 %v558_v52 }
 0x1ec   :  { %522 = vmatprep.subr.bf16.mxu0 %v720_v0  ;;  %v490_v0 = vld [vmem:[%s847_s9] ss:$0 sm:$0xff] }
 0x1ef   :  { %523 = vmatpush3.bf16.msra.mxu0 %v559_v53 }
 0x2aa   :  { %v366_v55 = vpop.f32.mrf.mxu0 }
 0x2ab   :  { %v367_v57 = vadd.f32 %v486_v54, %v366_v55 }
 0x2ac   :  { %v518_v56 = vpop.f32.mrf.mxu0 }
 0x2ad   :  { %v373_v61 = vmax.f32 %v367_v57, 0.0 }
 0x2ae   :  { %v369_v58 = vpop.f32.mrf.mxu0 }
 0x2af   :  { %v370_v59 = vadd.f32 %v486_v54, %v369_v58 }
 0x2b0   :  { %v519_v60 = vpop.f32.mrf.mxu0 }
 0x2b1   :  { %v374_v62 = vmax.f32 %v370_v59, 0.0 }
 0x2b3   :  { %v375_v63 = vpack.c.bf16 %v374_v62, %v373_v61 }
 0x2b5   :  { %525 = vmatmul.mubr.msk.bf16.vlgmr.msra.gmra.mxu0 %vm328_vm5, %v375_v63 }
 0x375   :  { %v436_v1 = vpop.f32.mrf.mxu0 }
 0x376   :  { %v437_v2 = vadd.f32 %v490_v0, %v436_v1 }
 0x377   :  { %v526_v3 = vpop.f32.mrf.mxu0 }
 0x378   :  { %v496_v4 = vpack.c.bf16 %v437_v2, %v437_v2 }
 0x379   :  { %v439_v5 = vpop.f32.mrf.mxu0 }
 0x37a   :  { %v440_v6 = vadd.f32 %v490_v0, %v439_v5  ;;  %452 = vst.msk [vmem:[#allocation13] sm:$0xf] %vm451_vm6, %v496_v4 }
 0x37b   :  { %v527_v7 = vpop.f32.mrf.mxu0 }
 0x37c   :  { %v497_v8 = vpack.c.bf16 %v440_v6, %v440_v6 }
 0x37e   :  { %453 = vst.msk [vmem:[#allocation13 + $0x4] sm:$0xf] %vm451_vm6, %v497_v8 }
 0x37f   :  { %691 = shalt.err (!%p688_p6)
}
 0x380   :  { %465 = dma.vmem_to_hbm [thread:$0]  %s460_s27, 128, %s848_s10, [#allocation4], %s716_s4, %s716_s4, %s717_s12  }
 0x381   :  { %708 = dma.done.wait [#allocation4], 128  }
 0x382   :  { %709 = vsyncadd [#allocation4], 4294967168 }
 0x383   :  { %469 = vsyncpa [#allocation3], 1 }
 0x384   :  { %470 = vsyncpa [#allocation6], 1 }
 0x385   :  { %471 = vsyncpa [#allocation9], 1 }
 0x386   :  { %472 = vsyncpa [#allocation12], 1 }
 0x387   :  { %473 = vsyncpa [#allocation4], 1 }

</bundles_post_ra>
